<compile_context>
chip_gen: v6e
topology: v6e:2x2x1
jax: 0.10.0
libtpu: 0.0.40
codegen_flags: <defaults>
</compile_context>

<pallas_src>
import functools
import math

import jax
import jax.numpy as jnp
from jax import lax
from jax.experimental import pallas as pl
from jax.experimental.pallas import tpu as pltpu


def _round_up(x, m):
    return (x + m - 1) // m * m


def _default_token_tile():
    # v6e / v7x MXU is 2x256^2 -> 256-row LHS tiles fill the array; v5x MXU is 4x128^2.
    try:
        kind = jax.devices()[0].device_kind.lower()
    except Exception:
        return 256
    return 128 if "v5" in kind else 256


def _embedding_kernel(ids_ref, w_ref, o_ref, *, scale):
    """One grid step: gather `tile` table rows via a one-hot MXU matmul."""
    # ids_ref: (tile, 1) int32   token ids for this tile
    # w_ref:   (V, D)            embedding table, VMEM-resident (constant index_map)
    # o_ref:   (tile, D)         output tile
    vocab = w_ref.shape[0]
    tile = o_ref.shape[0]

    # Clamp: out-of-range ids would otherwise select garbage (no OOB check in VMEM).
    ids = jnp.clip(ids_ref[...], 0, vocab - 1)                       # (tile, 1)

    # (tile, V) one-hot selection matrix in the weight dtype (lane iota == id broadcast).
    col = lax.broadcasted_iota(jnp.int32, (tile, vocab), 1)
    one_hot = (col == ids).astype(w_ref.dtype)

    # Row gather as an MXU matmul; accumulate in f32, scale once, cast once.
    acc = jnp.dot(one_hot, w_ref[...], preferred_element_type=jnp.float32)
    o_ref[...] = (acc * scale).astype(o_ref.dtype)


def _embedding_call(ids_col, weight, *, tile, scale, vmem_budget, single_buffer_table):
    vocab, d_model = weight.shape
    n_pad = ids_col.shape[0]

    w_spec_kwargs = {}
    if single_buffer_table:
        # Constant block index -> fetched once; Buffered(1) halves the table's VMEM footprint.
        w_spec_kwargs["pipeline_mode"] = pl.Buffered(1)

    return pl.pallas_call(
        functools.partial(_embedding_kernel, scale=scale),
        out_shape=jax.ShapeDtypeStruct((n_pad, d_model), weight.dtype),
        grid=(n_pad // tile,),
        in_specs=[
            pl.BlockSpec((tile, 1), lambda i: (i, 0)),                           # ids tile
            pl.BlockSpec((vocab, d_model), lambda i: (0, 0), **w_spec_kwargs),   # resident table
        ],
        out_specs=pl.BlockSpec((tile, d_model), lambda i: (i, 0)),
        compiler_params=pltpu.CompilerParams(
            dimension_semantics=("parallel",),   # independent tiles; both TCs on v7x
            vmem_limit_bytes=vmem_budget,
        ),
    )(ids_col, weight)


def embedding(ids, weight, *, token_tile=None):
    """Pallas equivalent of `nn.Embedding(vocab, d_model)(ids) * sqrt(d_model)`."""
    vocab, d_model = weight.shape
    lead_shape = ids.shape
    ids_flat = ids.reshape(-1).astype(jnp.int32)
    n_tokens = ids_flat.shape[0]

    itemsize = jnp.dtype(weight.dtype).itemsize
    sublane = max(8, 32 // max(itemsize, 1))       # f32 -> 8, bf16 -> 16, int8/fp8 -> 32

    if token_tile is None:
        token_tile = _default_token_tile()

    tile = min(_round_up(token_tile, sublane), _round_up(n_tokens, sublane))
    n_pad = _round_up(n_tokens, tile)
    if n_pad != n_tokens:
        ids_flat = jnp.pad(ids_flat, (0, n_pad - n_tokens))           # pad with row 0 (valid)
    ids_col = ids_flat.reshape(n_pad, 1)

    # VMEM budget: one resident table copy (Buffered(1)) + double-buffered ids/output tiles
    # + one-hot intermediate + headroom, clamped to a sane range.
    table_bytes = vocab * d_model * itemsize
    tile_bytes = tile * d_model * itemsize + tile * 4
    onehot_bytes = tile * max(vocab, 128) * itemsize
    vmem_budget = int(min(max(table_bytes + 2 * tile_bytes + onehot_bytes + (4 << 20),
                              16 << 20), 100 << 20))

    scale = math.sqrt(d_model)
    try:
        out_flat = _embedding_call(ids_col, weight, tile=tile, scale=scale,
                                   vmem_budget=vmem_budget, single_buffer_table=True)
    except Exception:
        # Fallback if pipeline_mode=pl.Buffered(1) is not supported by the installed jax.
        out_flat = _embedding_call(ids_col, weight, tile=tile, scale=scale,
                                   vmem_budget=vmem_budget, single_buffer_table=False)

    return out_flat[:n_tokens].reshape(*lead_shape, d_model)


if __name__ == "__main__":
    # Small shapes consistent with the module: batch=2, seq=8, vocab=128, d_model=128.
    B, S, VOCAB, D_MODEL = 2, 8, 128, 128

    key = jax.random.PRNGKey(0)
    k_w, k_ids = jax.random.split(key)
    weight = jax.random.normal(k_w, (VOCAB, D_MODEL), dtype=jnp.float32)
    ids = jax.random.randint(k_ids, (B, S), 0, VOCAB, dtype=jnp.int32)

    out = embedding(ids, weight)
    jax.block_until_ready(out)

    ref = weight[ids] * math.sqrt(D_MODEL)
    assert out.shape == (B, S, D_MODEL)
    # One-hot row selection: any gather error would differ at O(1); tolerance covers the
    # MXU's internal f32 matmul rounding.
    assert jnp.allclose(out, ref, atol=1e-2, rtol=1e-2), "embedding mismatch"

    print("KERNEL_OK")
</pallas_src>

<mosaic_0001>
module attributes {stable_mosaic.version = 11 : i64} {
  func.func @_embedding_kernel(%arg0: i32, %arg1: memref<16x1xi32, #tpu.memory_space<vmem>>, %arg2: memref<128x128xf32, #tpu.memory_space<vmem>>, %arg3: memref<16x128xf32, #tpu.memory_space<vmem>>) attributes {dimension_semantics = [#tpu.dimension_semantics<parallel>], iteration_bounds = array<i64: 1>, scalar_prefetch = 0 : i64, scratch_operands = 0 : i64, tpu.core_type = #tpu.core_type<tc>, window_params = [{transform_indices = @transform_0, window_bounds = array<i64: 16, 1>}, {pipeline_mode = #tpu.pipeline_mode<synchronous>, transform_indices = @transform_1, window_bounds = array<i64: 128, 128>}, {transform_indices = @transform_2, window_bounds = array<i64: 16, 128>}]} {
    %c0 = arith.constant 0 : index
    %c0_0 = arith.constant 0 : index
    %0 = vector.load %arg1[%c0, %c0_0] : memref<16x1xi32, #tpu.memory_space<vmem>>, vector<16x1xi32>
    %c0_i32 = arith.constant 0 : i32
    %c127_i32 = arith.constant 127 : i32
    %1 = vector.broadcast %c0_i32 : i32 to vector<16x1xi32>
    %2 = arith.maxsi %1, %0 : vector<16x1xi32>
    %3 = vector.broadcast %c127_i32 : i32 to vector<16x1xi32>
    %4 = arith.minsi %3, %2 : vector<16x1xi32>
    %5 = tpu.iota {dimensions = array<i32: 1>} : vector<16x128xi32>
    %6 = vector.broadcast %4 : vector<16x1xi32> to vector<16x128xi32>
    %7 = arith.cmpi eq, %5, %6 : vector<16x128xi32>
    %8 = arith.extui %7 : vector<16x128xi1> to vector<16x128xi32>
    %9 = arith.sitofp %8 : vector<16x128xi32> to vector<16x128xf32>
    %c0_1 = arith.constant 0 : index
    %c0_2 = arith.constant 0 : index
    %10 = vector.load %arg2[%c0_1, %c0_2] : memref<128x128xf32, #tpu.memory_space<vmem>>, vector<128x128xf32>
    %cst = arith.constant dense<0.000000e+00> : vector<16x128xf32>
    %11 = tpu.matmul %9, %10, %cst {dimension_numbers = #tpu.dot_dimension_numbers<[1], [0], [0], [1], [0, 0, 1, 1], [], []>} : vector<16x128xf32>, vector<128x128xf32>, vector<16x128xf32> -> vector<16x128xf32>
    %cst_3 = arith.constant 11.3137083 : f32
    %12 = vector.broadcast %cst_3 : f32 to vector<16x128xf32>
    %13 = arith.mulf %11, %12 : vector<16x128xf32>
    %c0_4 = arith.constant 0 : index
    %c0_5 = arith.constant 0 : index
    %14 = vector.load %arg3[%c0_4, %c0_5] : memref<16x128xf32, #tpu.memory_space<vmem>>, vector<16x128xf32>
    tpu.vector_store %arg3[%c0_4, %c0_5], %13 {strides = array<i32>} : memref<16x128xf32, #tpu.memory_space<vmem>>, vector<16x128xf32>,
    return
  }
  func.func @transform_0(%arg0: i32) -> (i32, i32) {
    %c0_i32 = arith.constant 0 : i32
    %c0_i32_0 = arith.constant 0 : i32
    return %arg0, %c0_i32 : i32, i32
  }
  func.func @transform_1(%arg0: i32) -> (i32, i32) {
    %c0_i32 = arith.constant 0 : i32
    %c0_i32_0 = arith.constant 0 : i32
    %c0_i32_1 = arith.constant 0 : i32
    return %c0_i32, %c0_i32_0 : i32, i32
  }
  func.func @transform_2(%arg0: i32) -> (i32, i32) {
    %c0_i32 = arith.constant 0 : i32
    %c0_i32_0 = arith.constant 0 : i32
    return %arg0, %c0_i32 : i32, i32
  }
}

module attributes {stable_mosaic.version = 11 : i64} {
  func.func @_embedding_kernel(%arg0: i32, %arg1: memref<16x1xi32, #tpu.memory_space<vmem>>, %arg2: memref<128x128xf32, #tpu.memory_space<vmem>>, %arg3: memref<16x128xf32, #tpu.memory_space<vmem>>) attributes {dimension_semantics = [#tpu.dimension_semantics<parallel>], iteration_bounds = array<i64: 1>, scalar_prefetch = 0 : i64, scratch_operands = 0 : i64, tpu.core_type = #tpu.core_type<tc>, window_params = [{transform_indices = @transform_0, window_bounds = array<i64: 16, 1>}, {pipeline_mode = #tpu.pipeline_mode<synchronous>, transform_indices = @transform_1, window_bounds = array<i64: 128, 128>}, {transform_indices = @transform_2, window_bounds = array<i64: 16, 128>}]} {
    %c0 = arith.constant 0 : index
    %c0_0 = arith.constant 0 : index
    %0 = vector.load %arg1[%c0, %c0_0] : memref<16x1xi32, #tpu.memory_space<vmem>>, vector<16x1xi32>
    %c0_i32 = arith.constant 0 : i32
    %c127_i32 = arith.constant 127 : i32
    %1 = vector.broadcast %c0_i32 : i32 to vector<16x1xi32>
    %2 = arith.maxsi %1, %0 : vector<16x1xi32>
    %3 = vector.broadcast %c127_i32 : i32 to vector<16x1xi32>
    %4 = arith.minsi %3, %2 : vector<16x1xi32>
    %5 = tpu.iota {dimensions = array<i32: 1>} : vector<16x128xi32>
    %6 = vector.broadcast %4 : vector<16x1xi32> to vector<16x128xi32>
    %7 = arith.cmpi eq, %5, %6 : vector<16x128xi32>
    %8 = arith.extui %7 : vector<16x128xi1> to vector<16x128xi32>
    %9 = arith.sitofp %8 : vector<16x128xi32> to vector<16x128xf32>
    %c0_1 = arith.constant 0 : index
    %c0_2 = arith.constant 0 : index
    %10 = vector.load %arg2[%c0_1, %c0_2] : memref<128x128xf32, #tpu.memory_space<vmem>>, vector<128x128xf32>
    %cst = arith.constant dense<0.000000e+00> : vector<16x128xf32>
    %11 = tpu.matmul %9, %10, %cst {dimension_numbers = #tpu.dot_dimension_numbers<[1], [0], [0], [1], [0, 0, 1, 1], [], []>} : vector<16x128xf32>, vector<128x128xf32>, vector<16x128xf32> -> vector<16x128xf32>
    %cst_3 = arith.constant 11.3137083 : f32
    %12 = vector.broadcast %cst_3 : f32 to vector<16x128xf32>
    %13 = arith.mulf %11, %12 : vector<16x128xf32>
    %c0_4 = arith.constant 0 : index
    %c0_5 = arith.constant 0 : index
    %14 = vector.load %arg3[%c0_4, %c0_5] : memref<16x128xf32, #tpu.memory_space<vmem>>, vector<16x128xf32>
    tpu.vector_store %arg3[%c0_4, %c0_5], %13 {strides = array<i32>} : memref<16x128xf32, #tpu.memory_space<vmem>>, vector<16x128xf32>,
    return
  }
  func.func @transform_0(%arg0: i32) -> (i32, i32) {
    %c0_i32 = arith.constant 0 : i32
    %c0_i32_0 = arith.constant 0 : i32
    return %arg0, %c0_i32 : i32, i32
  }
  func.func @transform_1(%arg0: i32) -> (i32, i32) {
    %c0_i32 = arith.constant 0 : i32
    %c0_i32_0 = arith.constant 0 : i32
    %c0_i32_1 = arith.constant 0 : i32
    return %c0_i32, %c0_i32_0 : i32, i32
  }
  func.func @transform_2(%arg0: i32) -> (i32, i32) {
    %c0_i32 = arith.constant 0 : i32
    %c0_i32_0 = arith.constant 0 : i32
    return %arg0, %c0_i32 : i32, i32
  }
}

</mosaic_0001>

<bundles_post_ra>
// kernel: tpu_custom_call.1
= control target key start
LH: loop header
LB: loop body
LE: loop exit
PB: predicated region body
PF: predicated region fallthrough
CT: control target
= control target key end

     0   :  { %7 = vsyncpa [#allocation3], 0  ;;  %s309_s0 = inlined_call_operand.vmem [shape: s32[16,1], index: 0, kind: input, shape index: {}]   ;;  %s310_s1 = inlined_call_operand.hbm [shape: f32[128,128], index: 1, kind: input, shape index: {}]   ;;  %s311_s2 = inlined_call_operand.hbm [shape: f32[16,128], index: 2, kind: output, shape index: {}]  }
   0x1   :  { %8 = vsyncpa [#allocation4], 0  ;;  %s270_s9 = smov [#allocation2]  }
   0x2   :  { %s16_s10 = sshll.u32 %s270_s9, 4  ;;  %s17_s10 = int_to_ptr.vmem [resolvable:$true] %s16_s10 }
   0x3   :  { %s234_s11 = scalar_lea.vmem %s17_s10, 2048  ;;  %p239_p1 = scmp.lt.s32.totalorder %s17_s10, %s17_s10 }
   0x4   :  { %p235_p0 = scmp.ne.s32.totalorder %s17_s10, %s234_s11  ;;  %p240_p2 = scmp.lt.s32.totalorder %s234_s11, %s234_s11 }
   0x6   :  { %p241_p3 = por %p240_p2, %p239_p1 }
   0x8   :  { %p242_p4 = pnand %p241_p3, %p235_p0 }
   0xa   :  { %245 = shalt.err (!%p242_p4)
}
   0xb   :  { %s271_s12 = smov 128   ;;  %s272_s13 = smov 8  }
   0xc   :  { %22 = dma.hbm_to_vmem [thread:$0]  %s310_s1, 2048, %s17_s10, [#allocation3], %s271_s12, %s271_s12, %s272_s13  }
   0xd   :  { %266 = dma.done.wait [#allocation3], 2048  }
   0xe   :  { %267 = vsyncadd [#allocation3], 4294965248  ;;  %v273_v0 = vmov 0   ;;  %v26_v1 = vld [vmem:[%s309_s0] sm:$0xff]  ;;  %v27_v2 = vld [vmem:[%s309_s0 + $0x8] sm:$0xff]  ;;  %v36_v23 = vlaneseq  ;;  %v274_v26 = vmov 1.0  }
   0xf   :  { %225 = vset.pattern.permute.xlu0 %v273_v0  ;;  %v65_v3 = vld [vmem:[#allocation2 + $0x78] sm:$0xff]  ;;  %vm28_vm0 = vcmp.gt.s32.totalorder %v26_v1, 0  ;;  %vm30_vm1 = vcmp.gt.s32.totalorder %v27_v2, 0  ;;  %v64_v4 = vld [vmem:[#allocation2 + $0x70] sm:$0xff]  ;;  %v63_v7 = vld [vmem:[#allocation2 + $0x68] sm:$0xff]  ;;  %s275_s0 = smov [#allocation5]  }
  0x10   :  { %184 = vmatprep.subr.mxu0 %v65_v3  ;;  %v29_v5 = vsel %vm28_vm0, %v26_v1, 0  ;;  %v31_v6 = vsel %vm30_vm1, %v27_v2, 0  ;;  %v62_v9 = vld [vmem:[#allocation2 + $0x60] sm:$0xff]  ;;  %v61_v11 = vld [vmem:[#allocation2 + $0x58] sm:$0xff]  ;;  %v60_v12 = vld [vmem:[#allocation2 + $0x50] sm:$0xff]  ;;  %v37_v24 = vand.u32 127, %v36_v23 }
  0x11   :  { %185 = vmatpush3.msra.mxu0 %v65_v3  ;;  %vm32_vm2 = vcmp.lt.s32.totalorder %v29_v5, 127  ;;  %vm34_vm3 = vcmp.lt.s32.totalorder %v31_v6, 127  ;;  %v59_v13 = vld [vmem:[#allocation2 + $0x48] sm:$0xff]  ;;  %v58_v14 = vld [vmem:[#allocation2 + $0x40] sm:$0xff]  ;;  %v57_v15 = vld [vmem:[#allocation2 + $0x38] sm:$0xff]  ;;  %s150_s1 = sshll.u32 %s275_s0, 4  ;;  %s151_s1 = int_to_ptr.vmem [resolvable:$true] %s150_s1 }
  0x12   :  { %186 = vmatprep.subr.mxu0 %v64_v4  ;;  %v33_v8 = vsel %vm32_vm2, %v29_v5, 127  ;;  %v35_v10 = vsel %vm34_vm3, %v31_v6, 127  ;;  %v56_v16 = vld [vmem:[#allocation2 + $0x30] sm:$0xff]  ;;  %v55_v17 = vld [vmem:[#allocation2 + $0x28] sm:$0xff]  ;;  %v54_v18 = vld [vmem:[#allocation2 + $0x20] sm:$0xff]  ;;  %s246_s20 = scalar_lea.vmem %s151_s1, 256  ;;  %p251_p6 = scmp.lt.s32.totalorder %s151_s1, %s151_s1 }
  0x13   :  { %187 = vmatpush3.msra.mxu0 %v64_v4  ;;  %39 = vperm.xlu0 %225, %v33_v8   ;;  %v53_v19 = vld [vmem:[#allocation2 + $0x18] sm:$0xff]  ;;  %v52_v20 = vld [vmem:[#allocation2 + $0x10] sm:$0xff]  ;;  %v51_v21 = vld [vmem:[#allocation2 + $0x8] sm:$0xff]  ;;  %p247_p5 = scmp.ne.s32.totalorder %s151_s1, %s246_s20  ;;  %p252_p7 = scmp.lt.s32.totalorder %s246_s20, %s246_s20 }
  0x14   :  { %188 = vmatprep.subr.mxu0 %v63_v7  ;;  %v50_v22 = vld [vmem:[#allocation2] sm:$0xff] }
  0x15   :  { %189 = vmatpush3.msra.mxu0 %v63_v7  ;;  %p253_p8 = por %p252_p7, %p251_p6 }
  0x16   :  { %190 = vmatprep.subr.mxu0 %v62_v9 }
  0x17   :  { %191 = vmatpush3.msra.mxu0 %v62_v9  ;;  %42 = vperm.xlu0 %225, %v35_v10   ;;  %p254_p9 = pnand %p253_p8, %p247_p5 }
  0x18   :  { %192 = vmatprep.subr.mxu0 %v61_v11 }
  0x19   :  { %193 = vmatpush3.msra.mxu0 %v61_v11 }
  0x1a   :  { %194 = vmatprep.subr.mxu0 %v60_v12 }
  0x1b   :  { %195 = vmatpush3.msra.mxu0 %v60_v12 }
  0x1c   :  { %196 = vmatprep.subr.mxu0 %v59_v13 }
  0x1d   :  { %197 = vmatpush3.msra.mxu0 %v59_v13 }
  0x1e   :  { %198 = vmatprep.subr.mxu0 %v58_v14 }
  0x1f   :  { %199 = vmatpush3.msra.mxu0 %v58_v14 }
  0x20   :  { %200 = vmatprep.subr.mxu0 %v57_v15 }
  0x21   :  { %201 = vmatpush3.msra.mxu0 %v57_v15 }
  0x22   :  { %202 = vmatprep.subr.mxu0 %v56_v16 }
  0x23   :  { %203 = vmatpush3.msra.mxu0 %v56_v16 }
  0x24   :  { %204 = vmatprep.subr.mxu0 %v55_v17 }
  0x25   :  { %205 = vmatpush3.msra.mxu0 %v55_v17 }
  0x26   :  { %206 = vmatprep.subr.mxu0 %v54_v18 }
  0x27   :  { %207 = vmatpush3.msra.mxu0 %v54_v18 }
  0x28   :  { %208 = vmatprep.subr.mxu0 %v53_v19 }
  0x29   :  { %209 = vmatpush3.msra.mxu0 %v53_v19 }
  0x2a   :  { %210 = vmatprep.subr.mxu0 %v52_v20 }
  0x2b   :  { %211 = vmatpush3.msra.mxu0 %v52_v20 }
  0x2c   :  { %212 = vmatprep.subr.mxu0 %v51_v21 }
  0x2d   :  { %213 = vmatpush3.msra.mxu0 %v51_v21 }
  0x2e   :  { %214 = vmatprep.subr.mxu0 %v50_v22 }
  0x2f   :  { %215 = vmatpush3.msra.mxu0 %v50_v22 }
  0x8e   :  { %v40_v25 = vpop.permute.xlu0 %39 }
  0x8f   :  { %vm44_vm4 = vcmp.eq.s32.totalorder %v37_v24, %v40_v25 }
  0x90   :  { %216 = vmatprep.mubr.msk.f32.mxu0 %vm44_vm4, %v274_v26 }
  0x92   :  { %v43_v27 = vpop.permute.xlu0 %42 }
  0x93   :  { %vm45_vm5 = vcmp.eq.s32.totalorder %v37_v24, %v43_v27 }
  0x94   :  { %217 = vmatmul.mubr.msk.f32.vlgmr.msra.gmra.mxu0 %vm45_vm5, %v274_v26 }
 0x154   :  { %v218_v28 = vpop.f32.mrf.mxu0 }
 0x155   :  { %v142_v29 = vmul.f32 11.313708, %v218_v28 }
 0x156   :  { %v132_v30 = vpop.f32.mrf.mxu0 }
 0x157   :  { %144 = vst [vmem:[#allocation5 + $0x8] sm:$0xff] %v142_v29  ;;  %v141_v31 = vmul.f32 11.313708, %v132_v30 }
 0x159   :  { %143 = vst [vmem:[#allocation5] sm:$0xff] %v141_v31 }
 0x15a   :  { %257 = shalt.err (!%p254_p9)
}
 0x15b   :  { %156 = dma.vmem_to_hbm [thread:$0]  %s151_s1, 256, %s311_s2, [#allocation4], %s271_s12, %s271_s12, %s272_s13  }
 0x15c   :  { %268 = dma.done.wait [#allocation4], 256  }
 0x15d   :  { %269 = vsyncadd [#allocation4], 4294967040 }
 0x15e   :  { %160 = vsyncpa [#allocation3], 1 }
 0x15f   :  { %161 = vsyncpa [#allocation4], 1 }

// kernel: tpu_custom_call.1
= control target key start
LH: loop header
LB: loop body
LE: loop exit
PB: predicated region body
PF: predicated region fallthrough
CT: control target
= control target key end

     0   :  { %7 = vsyncpa [#allocation3], 0  ;;  %s309_s0 = inlined_call_operand.vmem [shape: s32[16,1], index: 0, kind: input, shape index: {}]   ;;  %s310_s1 = inlined_call_operand.hbm [shape: f32[128,128], index: 1, kind: input, shape index: {}]   ;;  %s311_s2 = inlined_call_operand.hbm [shape: f32[16,128], index: 2, kind: output, shape index: {}]  }
   0x1   :  { %8 = vsyncpa [#allocation4], 0  ;;  %s270_s9 = smov [#allocation2]  }
   0x2   :  { %s16_s10 = sshll.u32 %s270_s9, 4  ;;  %s17_s10 = int_to_ptr.vmem [resolvable:$true] %s16_s10 }
   0x3   :  { %s234_s11 = scalar_lea.vmem %s17_s10, 2048  ;;  %p239_p1 = scmp.lt.s32.totalorder %s17_s10, %s17_s10 }
   0x4   :  { %p235_p0 = scmp.ne.s32.totalorder %s17_s10, %s234_s11  ;;  %p240_p2 = scmp.lt.s32.totalorder %s234_s11, %s234_s11 }
   0x6   :  { %p241_p3 = por %p240_p2, %p239_p1 }
   0x8   :  { %p242_p4 = pnand %p241_p3, %p235_p0 }
   0xa   :  { %245 = shalt.err (!%p242_p4)
}
   0xb   :  { %s271_s12 = smov 128   ;;  %s272_s13 = smov 8  }
   0xc   :  { %22 = dma.hbm_to_vmem [thread:$0]  %s310_s1, 2048, %s17_s10, [#allocation3], %s271_s12, %s271_s12, %s272_s13  }
   0xd   :  { %266 = dma.done.wait [#allocation3], 2048  }
   0xe   :  { %267 = vsyncadd [#allocation3], 4294965248  ;;  %v273_v0 = vmov 0   ;;  %v26_v1 = vld [vmem:[%s309_s0] sm:$0xff]  ;;  %v27_v2 = vld [vmem:[%s309_s0 + $0x8] sm:$0xff]  ;;  %v36_v23 = vlaneseq  ;;  %v274_v26 = vmov 1.0  }
   0xf   :  { %225 = vset.pattern.permute.xlu0 %v273_v0  ;;  %v65_v3 = vld [vmem:[#allocation2 + $0x78] sm:$0xff]  ;;  %vm28_vm0 = vcmp.gt.s32.totalorder %v26_v1, 0  ;;  %vm30_vm1 = vcmp.gt.s32.totalorder %v27_v2, 0  ;;  %v64_v4 = vld [vmem:[#allocation2 + $0x70] sm:$0xff]  ;;  %v63_v7 = vld [vmem:[#allocation2 + $0x68] sm:$0xff]  ;;  %s275_s0 = smov [#allocation5]  }
  0x10   :  { %184 = vmatprep.subr.mxu0 %v65_v3  ;;  %v29_v5 = vsel %vm28_vm0, %v26_v1, 0  ;;  %v31_v6 = vsel %vm30_vm1, %v27_v2, 0  ;;  %v62_v9 = vld [vmem:[#allocation2 + $0x60] sm:$0xff]  ;;  %v61_v11 = vld [vmem:[#allocation2 + $0x58] sm:$0xff]  ;;  %v60_v12 = vld [vmem:[#allocation2 + $0x50] sm:$0xff]  ;;  %v37_v24 = vand.u32 127, %v36_v23 }
  0x11   :  { %185 = vmatpush3.msra.mxu0 %v65_v3  ;;  %vm32_vm2 = vcmp.lt.s32.totalorder %v29_v5, 127  ;;  %vm34_vm3 = vcmp.lt.s32.totalorder %v31_v6, 127  ;;  %v59_v13 = vld [vmem:[#allocation2 + $0x48] sm:$0xff]  ;;  %v58_v14 = vld [vmem:[#allocation2 + $0x40] sm:$0xff]  ;;  %v57_v15 = vld [vmem:[#allocation2 + $0x38] sm:$0xff]  ;;  %s150_s1 = sshll.u32 %s275_s0, 4  ;;  %s151_s1 = int_to_ptr.vmem [resolvable:$true] %s150_s1 }
  0x12   :  { %186 = vmatprep.subr.mxu0 %v64_v4  ;;  %v33_v8 = vsel %vm32_vm2, %v29_v5, 127  ;;  %v35_v10 = vsel %vm34_vm3, %v31_v6, 127  ;;  %v56_v16 = vld [vmem:[#allocation2 + $0x30] sm:$0xff]  ;;  %v55_v17 = vld [vmem:[#allocation2 + $0x28] sm:$0xff]  ;;  %v54_v18 = vld [vmem:[#allocation2 + $0x20] sm:$0xff]  ;;  %s246_s20 = scalar_lea.vmem %s151_s1, 256  ;;  %p251_p6 = scmp.lt.s32.totalorder %s151_s1, %s151_s1 }
  0x13   :  { %187 = vmatpush3.msra.mxu0 %v64_v4  ;;  %39 = vperm.xlu0 %225, %v33_v8   ;;  %v53_v19 = vld [vmem:[#allocation2 + $0x18] sm:$0xff]  ;;  %v52_v20 = vld [vmem:[#allocation2 + $0x10] sm:$0xff]  ;;  %v51_v21 = vld [vmem:[#allocation2 + $0x8] sm:$0xff]  ;;  %p247_p5 = scmp.ne.s32.totalorder %s151_s1, %s246_s20  ;;  %p252_p7 = scmp.lt.s32.totalorder %s246_s20, %s246_s20 }
  0x14   :  { %188 = vmatprep.subr.mxu0 %v63_v7  ;;  %v50_v22 = vld [vmem:[#allocation2] sm:$0xff] }
  0x15   :  { %189 = vmatpush3.msra.mxu0 %v63_v7  ;;  %p253_p8 = por %p252_p7, %p251_p6 }
  0x16   :  { %190 = vmatprep.subr.mxu0 %v62_v9 }
  0x17   :  { %191 = vmatpush3.msra.mxu0 %v62_v9  ;;  %42 = vperm.xlu0 %225, %v35_v10   ;;  %p254_p9 = pnand %p253_p8, %p247_p5 }
  0x18   :  { %192 = vmatprep.subr.mxu0 %v61_v11 }
  0x19   :  { %193 = vmatpush3.msra.mxu0 %v61_v11 }
  0x1a   :  { %194 = vmatprep.subr.mxu0 %v60_v12 }
  0x1b   :  { %195 = vmatpush3.msra.mxu0 %v60_v12 }
  0x1c   :  { %196 = vmatprep.subr.mxu0 %v59_v13 }
  0x1d   :  { %197 = vmatpush3.msra.mxu0 %v59_v13 }
  0x1e   :  { %198 = vmatprep.subr.mxu0 %v58_v14 }
  0x1f   :  { %199 = vmatpush3.msra.mxu0 %v58_v14 }
  0x20   :  { %200 = vmatprep.subr.mxu0 %v57_v15 }
  0x21   :  { %201 = vmatpush3.msra.mxu0 %v57_v15 }
  0x22   :  { %202 = vmatprep.subr.mxu0 %v56_v16 }
  0x23   :  { %203 = vmatpush3.msra.mxu0 %v56_v16 }
  0x24   :  { %204 = vmatprep.subr.mxu0 %v55_v17 }
  0x25   :  { %205 = vmatpush3.msra.mxu0 %v55_v17 }
  0x26   :  { %206 = vmatprep.subr.mxu0 %v54_v18 }
  0x27   :  { %207 = vmatpush3.msra.mxu0 %v54_v18 }
  0x28   :  { %208 = vmatprep.subr.mxu0 %v53_v19 }
  0x29   :  { %209 = vmatpush3.msra.mxu0 %v53_v19 }
  0x2a   :  { %210 = vmatprep.subr.mxu0 %v52_v20 }
  0x2b   :  { %211 = vmatpush3.msra.mxu0 %v52_v20 }
  0x2c   :  { %212 = vmatprep.subr.mxu0 %v51_v21 }
  0x2d   :  { %213 = vmatpush3.msra.mxu0 %v51_v21 }
  0x2e   :  { %214 = vmatprep.subr.mxu0 %v50_v22 }
  0x2f   :  { %215 = vmatpush3.msra.mxu0 %v50_v22 }
  0x8e   :  { %v40_v25 = vpop.permute.xlu0 %39 }
  0x8f   :  { %vm44_vm4 = vcmp.eq.s32.totalorder %v37_v24, %v40_v25 }
  0x90   :  { %216 = vmatprep.mubr.msk.f32.mxu0 %vm44_vm4, %v274_v26 }
  0x92   :  { %v43_v27 = vpop.permute.xlu0 %42 }
  0x93   :  { %vm45_vm5 = vcmp.eq.s32.totalorder %v37_v24, %v43_v27 }
  0x94   :  { %217 = vmatmul.mubr.msk.f32.vlgmr.msra.gmra.mxu0 %vm45_vm5, %v274_v26 }
 0x154   :  { %v218_v28 = vpop.f32.mrf.mxu0 }
 0x155   :  { %v142_v29 = vmul.f32 11.313708, %v218_v28 }
 0x156   :  { %v132_v30 = vpop.f32.mrf.mxu0 }
 0x157   :  { %144 = vst [vmem:[#allocation5 + $0x8] sm:$0xff] %v142_v29  ;;  %v141_v31 = vmul.f32 11.313708, %v132_v30 }
 0x159   :  { %143 = vst [vmem:[#allocation5] sm:$0xff] %v141_v31 }
 0x15a   :  { %257 = shalt.err (!%p254_p9)
}
 0x15b   :  { %156 = dma.vmem_to_hbm [thread:$0]  %s151_s1, 256, %s311_s2, [#allocation4], %s271_s12, %s271_s12, %s272_s13  }
 0x15c   :  { %268 = dma.done.wait [#allocation4], 256  }
 0x15d   :  { %269 = vsyncadd [#allocation4], 4294967040 }
 0x15e   :  { %160 = vsyncpa [#allocation3], 1 }
 0x15f   :  { %161 = vsyncpa [#allocation4], 1 }

</bundles_post_ra>
